<compile_context>
chip_gen: v7x
topology: tpu7x:2x2x1
jax: 0.10.0
libtpu: 0.0.40
codegen_flags: <defaults>
</compile_context>

<pallas_src>
import functools

import jax
import jax.numpy as jnp
import numpy as np
from jax import lax
from jax.experimental import pallas as pl
from jax.experimental.pallas import tpu as pltpu

_EPS = 1e-5  # nn.BatchNorm2d default


# --------------------------------------------------------------------------- #
# Helpers
# --------------------------------------------------------------------------- #
def _sublane_multiple(dtype):
    """Sublane packing granularity per dtype width (f32=8, bf16=16, int8=32)."""
    return {4: 8, 2: 16, 1: 32}.get(jnp.dtype(dtype).itemsize, 8)


def _vmem_budget_bytes():
    """Per-chip scoped VMEM budget: ~75% of physical, capped at 96 MiB."""
    phys = 64 * 1024 * 1024  # conservative default: v7x physical VMEM per TC
    try:
        info = pltpu.get_tpu_info()
        for name in ("vmem_capacity_bytes", "vmem_bytes", "vmem_size_bytes"):
            cap = getattr(info, name, None)
            if cap:
                phys = int(cap)
                break
    except Exception:
        pass
    return min(int(phys * 3 // 4), 96 * 1024 * 1024)


def _pick_tile(total, multiple, max_tile):
    """Largest divisor of `total` that is a multiple of `multiple` and <= max_tile.

    Falls back to `total` (full dimension), which always satisfies the Pallas
    block-shape constraint.
    """
    best = None
    cap = min(total, max_tile)
    t = multiple
    while t <= cap:
        if total % t == 0:
            best = t
        t += multiple
    return best if best is not None else total


# --------------------------------------------------------------------------- #
# Kernels
# --------------------------------------------------------------------------- #
def _fused_kernel(x_ref, gamma_ref, beta_ref, o_ref, *, count, eps):
    """Single HBM pass: per-channel stats + normalize + conditional affine."""
    x = x_ref[...].astype(jnp.float32)                           # (N, C_TILE, HW_pad)
    # Lane (XLU) reduce per (n, c) row, then add over the small N axis.
    s = jnp.sum(jnp.sum(x, axis=2, keepdims=True), axis=0, keepdims=True)
    q = jnp.sum(jnp.sum(x * x, axis=2, keepdims=True), axis=0, keepdims=True)
    inv_count = jnp.float32(1.0 / count)
    mean = s * inv_count                                         # (1, C_TILE, 1)
    var = jnp.maximum(q * inv_count - mean * mean, 0.0)          # biased variance
    inv_std = lax.rsqrt(var + jnp.float32(eps))
    scale = gamma_ref[...] * inv_std                             # (N, C_TILE, 1)
    shift = beta_ref[...] - mean * scale                         # (N, C_TILE, 1)
    o_ref[...] = (x * scale + shift).astype(o_ref.dtype)


def _row_stats_kernel(x_ref, sum_ref, sq_ref):
    """Two-pass path, pass 1: per-(n,c) row partial sums; accumulate in the
    output block (resident across the hw reduction axis, no scratch needed)."""
    @pl.when(pl.program_id(1) == 0)
    def _init():
        sum_ref[...] = jnp.zeros_like(sum_ref)
        sq_ref[...] = jnp.zeros_like(sq_ref)

    x = x_ref[...].astype(jnp.float32)                           # (RC_TILE, HW_TILE)
    sum_ref[...] += jnp.sum(x, axis=1, keepdims=True)            # (RC_TILE, 1)
    sq_ref[...] += jnp.sum(x * x, axis=1, keepdims=True)         # (RC_TILE, 1)


def _apply_kernel(x_ref, scale_ref, shift_ref, o_ref):
    """Two-pass path, pass 2: out = scale * x + shift (stats + gamma/beta folded)."""
    x = x_ref[...].astype(jnp.float32)                           # (RC_TILE, HW_TILE)
    o_ref[...] = (x * scale_ref[...] + shift_ref[...]).astype(o_ref.dtype)


# --------------------------------------------------------------------------- #
# Wrapper
# --------------------------------------------------------------------------- #
@functools.partial(jax.jit, static_argnames=("eps", "force_two_pass"))
def conditional_batch_norm_2d(x, condition, gamma_weight, beta_weight,
                              eps=_EPS, force_two_pass=False):
    """x: [N, C, H, W] (NCHW, like PyTorch); condition: [N] int32."""
    N, C, H, W = x.shape
    HW = H * W
    HW_pad = ((HW + 127) // 128) * 128          # lane-dense stores (mult. of 128)
    count = N * HW                               # true element count per channel
    itemsize = jnp.dtype(x.dtype).itemsize
    sublane = _sublane_multiple(x.dtype)
    budget = _vmem_budget_bytes()

    # Tiny nn.Embedding row gathers stay as JAX glue (N scalar lookups).
    # TODO(synk): PyTorch training-mode BN also updates running_mean/running_var
    # buffers; only the forward output is reproduced here.
    gamma = jnp.take(gamma_weight, condition, axis=0).astype(jnp.float32)   # (N, C)
    beta = jnp.take(beta_weight, condition, axis=0).astype(jnp.float32)     # (N, C)

    x3 = x.reshape(N, C, HW)
    if HW_pad != HW:
        # Zero padding is exact for the stats since we divide by the true count.
        x3 = jnp.pad(x3, ((0, 0), (0, 0), (0, HW_pad - HW)))

    # ---- Choose the fused single-pass path when the channel slab fits VMEM ----
    fused_c_tile = None
    if not force_two_pass:
        cands = {C}
        t = sublane
        while t < C:
            if C % t == 0:
                cands.add(t)
            t += sublane

        def _fits(ct):
            slab = N * ct * HW_pad
            # 2x input + 2x output double-buffers + ~1 fp32 working copy.
            return slab * (4 * itemsize + 4) <= budget

        fitting = [ct for ct in cands if _fits(ct)]
        if fitting:
            fused_c_tile = max(fitting)

    if fused_c_tile is not None:
        ct = fused_c_tile
        n_c = C // ct
        gamma3 = gamma[:, :, None]                                   # (N, C, 1)
        beta3 = beta[:, :, None]
        out = pl.pallas_call(
            functools.partial(_fused_kernel, count=count, eps=eps),
            out_shape=jax.ShapeDtypeStruct((N, C, HW_pad), x.dtype),
            grid=(n_c,),
            in_specs=[pl.BlockSpec((N, ct, HW_pad), lambda c: (0, c, 0)),
                      pl.BlockSpec((N, ct, 1), lambda c: (0, c, 0)),
                      pl.BlockSpec((N, ct, 1), lambda c: (0, c, 0))],
            out_specs=pl.BlockSpec((N, ct, HW_pad), lambda c: (0, c, 0)),
            compiler_params=pltpu.CompilerParams(
                dimension_semantics=("parallel",),
                vmem_limit_bytes=budget),
        )(x3, gamma3, beta3)
        if HW_pad != HW:
            out = out[:, :, :HW]
        return out.reshape(N, C, H, W)

    # ---- Two-pass fallback in (N*C, HW) layout --------------------------------
    RC = N * C
    x2 = x3.reshape(RC, HW_pad)

    HW_TILE = _pick_tile(HW_pad, 128, 8192)                         # lane axis
    max_block_bytes = min(8 * 1024 * 1024, budget // 8)             # 4-8 MiB blocks
    rc_cap = max(sublane,
                 (max_block_bytes // max(HW_TILE * itemsize, 1)) // sublane * sublane)
    RC_TILE = _pick_tile(RC, sublane, rc_cap)                       # sublane axis
    n_rc = RC // RC_TILE
    n_hw = HW_pad // HW_TILE

    # Pass 1: per-row partial sums (rc "parallel", hw reduction "arbitrary").
    row_sum, row_sq = pl.pallas_call(
        _row_stats_kernel,
        out_shape=(jax.ShapeDtypeStruct((RC, 1), jnp.float32),
                   jax.ShapeDtypeStruct((RC, 1), jnp.float32)),
        grid=(n_rc, n_hw),
        in_specs=[pl.BlockSpec((RC_TILE, HW_TILE), lambda r, h: (r, h))],
        out_specs=(pl.BlockSpec((RC_TILE, 1), lambda r, h: (r, 0)),
                   pl.BlockSpec((RC_TILE, 1), lambda r, h: (r, 0))),
        compiler_params=pltpu.CompilerParams(
            dimension_semantics=("parallel", "arbitrary"),
            vmem_limit_bytes=budget),
    )(x2)

    # Tiny JAX glue: reduce over N, fold BN stats + gamma/beta into scale/shift.
    ch_sum = row_sum.reshape(N, C).sum(axis=0)
    ch_sq = row_sq.reshape(N, C).sum(axis=0)
    inv_count = jnp.float32(1.0 / count)
    mean = ch_sum * inv_count
    var = jnp.maximum(ch_sq * inv_count - mean * mean, 0.0)         # biased variance
    inv_std = lax.rsqrt(var + jnp.float32(eps))
    scale = gamma * inv_std[None, :]                                 # (N, C)
    shift = beta - mean[None, :] * scale                             # (N, C)
    scale2 = scale.reshape(RC, 1)
    shift2 = shift.reshape(RC, 1)

    # Pass 2: fused normalize + conditional affine, fully parallel grid.
    out = pl.pallas_call(
        _apply_kernel,
        out_shape=jax.ShapeDtypeStruct((RC, HW_pad), x.dtype),
        grid=(n_rc, n_hw),
        in_specs=[pl.BlockSpec((RC_TILE, HW_TILE), lambda r, h: (r, h)),
                  pl.BlockSpec((RC_TILE, 1), lambda r, h: (r, 0)),
                  pl.BlockSpec((RC_TILE, 1), lambda r, h: (r, 0))],
        out_specs=pl.BlockSpec((RC_TILE, HW_TILE), lambda r, h: (r, h)),
        compiler_params=pltpu.CompilerParams(
            dimension_semantics=("parallel", "parallel"),
            vmem_limit_bytes=budget),
    )(x2, scale2, shift2)

    if HW_pad != HW:
        out = out[:, :HW]
    return out.reshape(N, C, H, W)


# --------------------------------------------------------------------------- #
# Reference + test
# --------------------------------------------------------------------------- #
def _reference(x, condition, gamma_weight, beta_weight, eps=_EPS):
    # Pure-JAX reference matching PyTorch training-mode BatchNorm2d(affine=False).
    mean = jnp.mean(x, axis=(0, 2, 3), keepdims=True)
    var = jnp.mean((x - mean) ** 2, axis=(0, 2, 3), keepdims=True)
    x_norm = (x - mean) * lax.rsqrt(var + eps)
    gamma = jnp.take(gamma_weight, condition, axis=0)[:, :, None, None]
    beta = jnp.take(beta_weight, condition, axis=0)[:, :, None, None]
    return gamma * x_norm + beta


if __name__ == "__main__":
    key = jax.random.PRNGKey(0)
    num_conditions = 8

    def run_case(shape, force_two_pass):
        N, C, H, W = shape
        kx, kc, kg, kb = jax.random.split(jax.random.fold_in(key, H * W), 4)
        x = jax.random.normal(kx, (N, C, H, W), dtype=jnp.float32)
        condition = jax.random.randint(kc, (N,), 0, num_conditions, dtype=jnp.int32)
        # Module init is ones/zeros; perturb slightly so the conditional affine
        # path (embedding gather + scale/shift fold) is actually exercised.
        gamma_weight = (jnp.ones((num_conditions, C), jnp.float32)
                        + 0.1 * jax.random.normal(kg, (num_conditions, C), jnp.float32))
        beta_weight = 0.1 * jax.random.normal(kb, (num_conditions, C), jnp.float32)

        out = conditional_batch_norm_2d(x, condition, gamma_weight, beta_weight,
                                        force_two_pass=force_two_pass)
        out = jax.block_until_ready(out)
        ref = _reference(x, condition, gamma_weight, beta_weight)
        np.testing.assert_allclose(np.asarray(out), np.asarray(ref),
                                   rtol=1e-4, atol=1e-4)

    # Fused single-pass path (slab fits VMEM easily at this size).
    run_case((2, 4, 16, 16), force_two_pass=False)
    # Two-pass fallback + non-multiple-of-128 spatial size (HW=196 -> pad to 256).
    run_case((2, 4, 14, 14), force_two_pass=True)

    print("KERNEL_OK")
</pallas_src>

<mosaic_0001>
module attributes {stable_mosaic.version = 11 : i64} {
  func.func @_fused_kernel(%arg0: i32, %arg1: memref<2x4x256xf32, #tpu.memory_space<vmem>>, %arg2: memref<2x4x1xf32, #tpu.memory_space<vmem>>, %arg3: memref<2x4x1xf32, #tpu.memory_space<vmem>>, %arg4: memref<2x4x256xf32, #tpu.memory_space<vmem>>) attributes {dimension_semantics = [#tpu.dimension_semantics<parallel>], iteration_bounds = array<i64: 1>, scalar_prefetch = 0 : i64, scratch_operands = 0 : i64, tpu.core_type = #tpu.core_type<tc>, window_params = [{transform_indices = @transform_0, window_bounds = array<i64: 2, 4, 256>}, {transform_indices = @transform_1, window_bounds = array<i64: 2, 4, 1>}, {transform_indices = @transform_2, window_bounds = array<i64: 2, 4, 1>}, {transform_indices = @transform_3, window_bounds = array<i64: 2, 4, 256>}]} {
    %c0 = arith.constant 0 : index
    %c0_0 = arith.constant 0 : index
    %c0_1 = arith.constant 0 : index
    %0 = vector.load %arg1[%c0, %c0_0, %c0_1] : memref<2x4x256xf32, #tpu.memory_space<vmem>>, vector<2x4x256xf32>
    %cst = arith.constant dense<0.000000e+00> : vector<2x4xf32>
    %1 = vector.multi_reduction <add>, %0, %cst [2] : vector<2x4x256xf32> to vector<2x4xf32>
    %2 = vector.shape_cast %1 : vector<2x4xf32> to vector<2x4x1xf32>
    %cst_2 = arith.constant dense<0.000000e+00> : vector<4x1xf32>
    %3 = vector.multi_reduction <add>, %2, %cst_2 [0] : vector<2x4x1xf32> to vector<4x1xf32>
    %4 = vector.shape_cast %3 : vector<4x1xf32> to vector<1x4x1xf32>
    %5 = arith.mulf %0, %0 : vector<2x4x256xf32>
    %cst_3 = arith.constant dense<0.000000e+00> : vector<2x4xf32>
    %6 = vector.multi_reduction <add>, %5, %cst_3 [2] : vector<2x4x256xf32> to vector<2x4xf32>
    %7 = vector.shape_cast %6 : vector<2x4xf32> to vector<2x4x1xf32>
    %cst_4 = arith.constant dense<0.000000e+00> : vector<4x1xf32>
    %8 = vector.multi_reduction <add>, %7, %cst_4 [0] : vector<2x4x1xf32> to vector<4x1xf32>
    %9 = vector.shape_cast %8 : vector<4x1xf32> to vector<1x4x1xf32>
    %cst_5 = arith.constant 0.001953125 : f32
    %10 = vector.broadcast %cst_5 : f32 to vector<1x4x1xf32>
    %11 = arith.mulf %4, %10 : vector<1x4x1xf32>
    %cst_6 = arith.constant 0.001953125 : f32
    %12 = vector.broadcast %cst_6 : f32 to vector<1x4x1xf32>
    %13 = arith.mulf %9, %12 : vector<1x4x1xf32>
    %14 = arith.mulf %11, %11 : vector<1x4x1xf32>
    %15 = arith.subf %13, %14 : vector<1x4x1xf32>
    %cst_7 = arith.constant 0.000000e+00 : f32
    %16 = vector.broadcast %cst_7 : f32 to vector<1x4x1xf32>
    %17 = arith.maximumf %15, %16 : vector<1x4x1xf32>
    %cst_8 = arith.constant 9.99999974E-6 : f32
    %18 = vector.broadcast %cst_8 : f32 to vector<1x4x1xf32>
    %19 = arith.addf %17, %18 : vector<1x4x1xf32>
    %20 = math.rsqrt %19 : vector<1x4x1xf32>
    %c0_9 = arith.constant 0 : index
    %c0_10 = arith.constant 0 : index
    %c0_11 = arith.constant 0 : index
    %21 = vector.load %arg2[%c0_9, %c0_10, %c0_11] : memref<2x4x1xf32, #tpu.memory_space<vmem>>, vector<2x4x1xf32>
    %22 = vector.broadcast %20 : vector<1x4x1xf32> to vector<2x4x1xf32>
    %23 = arith.mulf %21, %22 : vector<2x4x1xf32>
    %c0_12 = arith.constant 0 : index
    %c0_13 = arith.constant 0 : index
    %c0_14 = arith.constant 0 : index
    %24 = vector.load %arg3[%c0_12, %c0_13, %c0_14] : memref<2x4x1xf32, #tpu.memory_space<vmem>>, vector<2x4x1xf32>
    %25 = vector.broadcast %11 : vector<1x4x1xf32> to vector<2x4x1xf32>
    %26 = arith.mulf %25, %23 : vector<2x4x1xf32>
    %27 = arith.subf %24, %26 : vector<2x4x1xf32>
    %28 = vector.broadcast %23 : vector<2x4x1xf32> to vector<2x4x256xf32>
    %29 = arith.mulf %0, %28 : vector<2x4x256xf32>
    %30 = vector.broadcast %27 : vector<2x4x1xf32> to vector<2x4x256xf32>
    %31 = arith.addf %29, %30 : vector<2x4x256xf32>
    %c0_15 = arith.constant 0 : index
    %c0_16 = arith.constant 0 : index
    %c0_17 = arith.constant 0 : index
    %32 = vector.load %arg4[%c0_15, %c0_16, %c0_17] : memref<2x4x256xf32, #tpu.memory_space<vmem>>, vector<2x4x256xf32>
    tpu.vector_store %arg4[%c0_15, %c0_16, %c0_17], %31 {strides = array<i32>} : memref<2x4x256xf32, #tpu.memory_space<vmem>>, vector<2x4x256xf32>,
    return
  }
  func.func @transform_0(%arg0: i32) -> (i32, i32, i32) {
    %c0_i32 = arith.constant 0 : i32
    %c0_i32_0 = arith.constant 0 : i32
    %c0_i32_1 = arith.constant 0 : i32
    return %c0_i32, %arg0, %c0_i32_0 : i32, i32, i32
  }
  func.func @transform_1(%arg0: i32) -> (i32, i32, i32) {
    %c0_i32 = arith.constant 0 : i32
    %c0_i32_0 = arith.constant 0 : i32
    %c0_i32_1 = arith.constant 0 : i32
    return %c0_i32, %arg0, %c0_i32_0 : i32, i32, i32
  }
  func.func @transform_2(%arg0: i32) -> (i32, i32, i32) {
    %c0_i32 = arith.constant 0 : i32
    %c0_i32_0 = arith.constant 0 : i32
    %c0_i32_1 = arith.constant 0 : i32
    return %c0_i32, %arg0, %c0_i32_0 : i32, i32, i32
  }
  func.func @transform_3(%arg0: i32) -> (i32, i32, i32) {
    %c0_i32 = arith.constant 0 : i32
    %c0_i32_0 = arith.constant 0 : i32
    %c0_i32_1 = arith.constant 0 : i32
    return %c0_i32, %arg0, %c0_i32_0 : i32, i32, i32
  }
}

</mosaic_0001>

<bundles_post_ra>
// kernel: conditional_batch_norm_2d.1
= control target key start
LH: loop header
LB: loop body
LE: loop exit
PB: predicated region body
PF: predicated region fallthrough
CT: control target
= control target key end

     0   :  { %vm22_vm0 = vcmask 1043456   ;;  %v140_v20 = vmov 0   ;;  %v141_v48 = vmov 839922192   ;;  %v85_v50 = vlaneseq  ;;  %s214_s0 = inlined_call_operand.vmem [shape: f32[2,4,256], index: 0, kind: input, shape index: {}]   ;;  %s215_s1 = inlined_call_operand.vmem [shape: f32[2,4,1], index: 1, kind: input, shape index: {}]   ;;  %s216_s2 = inlined_call_operand.vmem [shape: f32[2,4,1], index: 2, kind: input, shape index: {}]   ;;  %s217_s3 = inlined_call_operand.vmem [shape: f32[2,4,256], index: 3, kind: output, shape index: {}]  }
   0x1   :  { %v165_v0 = vld [vmem:[%s214_s0] sm:$0xff]  ;;  %v170_v1 = vld [vmem:[%s214_s0 + $0x8] sm:$0xff]  ;;  %135 = vset.pattern.permute.xlu1 %v140_v20  ;;  %134 = vset.pattern.permute.xlu0 %v140_v20  ;;  %v83_v49 = vunpack.c.l.s4 %v141_v48 }
   0x2   :  { %v18_v2 = vcombine.high %v165_v0, %v165_v0  ;;  %v23_v3 = vsel %vm22_vm0, %v165_v0, 0.0  ;;  %v36_v4 = vmul.f32 %v165_v0, %v165_v0  ;;  %v19_v5 = vcombine.high %v170_v1, %v170_v1  ;;  %v65_v37 = vld [vmem:[%s215_s1 + $0x4] sm:$0xf]  ;;  %v64_v38 = vld [vmem:[%s215_s1] sm:$0xf] }
   0x3   :  { %v28_v6 = vsel %vm22_vm0, %v170_v1, 0.0  ;;  %v37_v7 = vmul.f32 %v170_v1, %v170_v1  ;;  %v68_v42 = vld [vmem:[%s216_s2] sm:$0xf]  ;;  %v69_v46 = vld [vmem:[%s216_s2 + $0x4] sm:$0xf]  ;;  %v84_v51 = vunpack.c.0.s8 %v83_v49  ;;  %v86_v52 = vshrl.u32 %v85_v50, 7 }
   0x4   :  { %v24_v8 = vsel %vm22_vm0, %v18_v2, 0.0  ;;  %v40_v9 = vcombine.high %v36_v4, %v36_v4  ;;  %v44_v10 = vsel %vm22_vm0, %v36_v4, 0.0  ;;  %v29_v11 = vsel %vm22_vm0, %v19_v5, 0.0 }
   0x5   :  { %v25_v12 = vadd.f32 %v24_v8, %v23_v3  ;;  %v41_v13 = vcombine.high %v37_v7, %v37_v7  ;;  %v49_v15 = vsel %vm22_vm0, %v37_v7, 0.0  ;;  %v30_v17 = vadd.f32 %v29_v11, %v28_v6 }
   0x6   :  { %v45_v14 = vsel %vm22_vm0, %v40_v9, 0.0  ;;  %v87_v53 = vsub.s32 %v84_v51, %v86_v52 }
   0x7   :  { %26 = vadd.xlane.f32.xlu0 %v25_v12  ;;  %v46_v16 = vadd.f32 %v45_v14, %v44_v10  ;;  %v50_v18 = vsel %vm22_vm0, %v41_v13, 0.0 }
   0x8   :  { %v51_v19 = vadd.f32 %v50_v18, %v49_v15 }
   0x9   :  { %47 = vadd.xlane.f32.xlu1 %v46_v16 }
   0xb   :  { %31 = vadd.xlane.f32.xlu0 %v30_v17 }
   0xd   :  { %52 = vadd.xlane.f32.xlu1 %v51_v19 }
  0x94   :  { %v27_v21 = vpop.xlane.xlu0 %26 }
  0x95   :  { %v33_v24 = vsel %vm22_vm0, %v27_v21, 0.0 }
  0x96   :  { %v48_v22 = vpop.xlane.xlu1 %47 }
  0x97   :  { %v54_v28 = vsel %vm22_vm0, %v48_v22, 0.0 }
  0x98   :  { %v32_v23 = vpop.xlane.xlu0 %31 }
  0x99   :  { %v34_v25 = vsel %vm22_vm0, %v32_v23, 0.0 }
  0x9a   :  { %v35_v26 = vadd.f32 %v34_v25, %v33_v24  ;;  %v53_v27 = vpop.xlane.xlu1 %52 }
  0x9b   :  { %v55_v29 = vsel %vm22_vm0, %v53_v27, 0.0 }
  0x9c   :  { %v57_v30 = vmul.f32 0.001953125, %v35_v26  ;;  %v56_v31 = vadd.f32 %v55_v29, %v54_v28 }
  0x9e   :  { %v58_v32 = vmul.f32 0.001953125, %v56_v31  ;;  %v59_v33 = vmul.f32 %v57_v30, %v57_v30 }
  0xa0   :  { %v60_v34 = vsub.f32 %v58_v32, %v59_v33 }
  0xa2   :  { %v61_v35 = vmax.f32 %v60_v34, 0.0 }
  0xa4   :  { %v62_v36 = vadd.f32 1e-05, %v61_v35 }
  0xa6   :  { %138 = vrsqrt.f32 %v62_v36 }
  0xb0   :  { %v139_v39 = vpop.eup %138 }
  0xb1   :  { %v67_v40 = vmul.f32 %v139_v39, %v65_v37  ;;  %v66_v41 = vmul.f32 %v139_v39, %v64_v38 }
  0xb3   :  { %80 = vperm.xlu1 %135, %v67_v40   ;;  %76 = vperm.xlu0 %134, %v66_v41   ;;  %v70_v43 = vmul.f32 %v66_v41, %v57_v30  ;;  %v71_v45 = vmul.f32 %v67_v40, %v57_v30 }
  0xb5   :  { %v72_v44 = vsub.f32 %v68_v42, %v70_v43  ;;  %v73_v47 = vsub.f32 %v69_v46, %v71_v45 }
  0xb7   :  { %102 = vperm.xlu1 %135, %v72_v44  }
  0xbb   :  { %106 = vperm.xlu1 %135, %v73_v47  }
 0x132   :  { %v81_v54 = vpop.permute.xlu1 %80  ;;  %v77_v55 = vpop.permute.xlu0 %76 }
 0x133   :  { %v88_v56 = vrot.slane %v77_v55, %v87_v53  ;;  %v95_v58 = vrot.slane %v81_v54, %v87_v53 }
 0x135   :  { %v98_v59 = vmul.f32 %v88_v56, %v165_v0  ;;  %v99_v63 = vmul.f32 %v95_v58, %v170_v1 }
 0x136   :  { %v103_v57 = vpop.permute.xlu1 %102 }
 0x137   :  { %v114_v60 = vrot.slane %v103_v57, %v87_v53 }
 0x139   :  { %v124_v61 = vadd.f32 %v114_v60, %v98_v59 }
 0x13a   :  { %v107_v62 = vpop.permute.xlu1 %106 }
 0x13b   :  { %126 = vst [vmem:[%s217_s3] sm:$0xff] %v124_v61  ;;  %v121_v2 = vrot.slane %v107_v62, %v87_v53 }
 0x13d   :  { %v125_v3 = vadd.f32 %v121_v2, %v99_v63 }
 0x13f   :  { %127 = vst [vmem:[%s217_s3 + $0x8] sm:$0xff] %v125_v3 }

</bundles_post_ra>
